<compile_context>
chip_gen: v6e
topology: v6e:2x2x1
jax: 0.10.0
libtpu: 0.0.40
codegen_flags: <defaults>
</compile_context>

<pallas_src>
import jax
import jax.numpy as jnp
from jax.experimental import pallas as pl
from jax.experimental.pallas import tpu as pltpu

EPS = 1e-5                     # torch.nn.InstanceNorm2d default eps
_LANE = 128
_ACC_BUDGET = 512 * 1024       # target f32 accumulator bytes per row tile
_OUT_BLOCK_BUDGET = 8 << 20    # target resident output-block bytes per Cout tile


def _round_up(x, m):
    return (x + m - 1) // m * m


# ----------------------------------------------------------------------------
# XLA-side glue: pad + stride-2 de-interleave (taps stacked on the contraction axis).
# ----------------------------------------------------------------------------
def _deinterleave(x, Ho_pad, Wo_pad, compute_dtype):
    """x: (N, C, H, W) -> XD: (N, 6*C, (Ho_pad+1)*Wo_pad) with
    XD[n, (a*3+kx)*C + c, i*Wo_pad + wo] = x_pad[n, c, 2i+a, 2wo+kx] (zero padded)."""
    N, C, H, W = x.shape
    Hp = 2 * (Ho_pad + 1)
    Wp = 2 * Wo_pad + 2
    xp = jnp.pad(x.astype(compute_dtype),
                 ((0, 0), (0, 0), (1, Hp - H - 1), (1, Wp - W - 1)))
    xr = xp.reshape(N, C, Ho_pad + 1, 2, Wp)                 # rows -> (i, a)
    cols = [jax.lax.slice_in_dim(xr, kx, kx + 2 * Wo_pad, stride=2, axis=4)
            for kx in range(3)]                              # (N, C, Ho_pad+1, 2, Wo_pad)
    xd = jnp.stack(cols, axis=2)                             # (N, C, 3, Ho_pad+1, 2, Wo_pad)
    xd = jnp.transpose(xd, (0, 4, 2, 1, 3, 5))               # (N, 2, 3, C, Ho_pad+1, Wo_pad)
    return xd.reshape(N, 6 * C, (Ho_pad + 1) * Wo_pad)


def _pack_weights(w, compute_dtype):
    """OIHW (Cout,Cin,3,3) -> (Cout,6*Cin) for ky in {0,1} and (Cout,3*Cin) for ky=2,
    ordered (a/kx major, ci minor) to match the XD channel axis."""
    Cout, Cin = w.shape[0], w.shape[1]
    w01 = jnp.transpose(w[:, :, 0:2, :], (0, 2, 3, 1)).reshape(Cout, 6 * Cin)
    w2 = jnp.transpose(w[:, :, 2, :], (0, 2, 1)).reshape(Cout, 3 * Cin)
    return w01.astype(compute_dtype), w2.astype(compute_dtype)


# ----------------------------------------------------------------------------
# Tiling heuristics.
# ----------------------------------------------------------------------------
def _choose_cout_split(Cout, N, hw_est, out_elem_bytes):
    """Pick the number of Cout tiles (extra 'parallel' axis; also bounds the resident
    output block).  Cout_blk must be a multiple of 8 (or the whole Cout)."""
    cands = [n for n in range(1, Cout + 1)
             if Cout % n == 0 and (n == 1 or (Cout // n) % 8 == 0)]
    want = 2 if N == 1 else 1            # keep both TensorCores busy when N == 1 (v7x)
    fit = [n for n in cands
           if (Cout // n) * hw_est * out_elem_bytes <= _OUT_BLOCK_BUDGET]
    pool = [n for n in fit if n >= want] or fit or [cands[-1]]
    n_co = min(pool)
    return n_co, Cout // n_co


def _choose_row_tile(Ho, Wo_pad, Cout_blk, acc_budget):
    """Largest row tile with a ~acc_budget f32 accumulator; TW stays a mult. of 128."""
    tw_lanes = max(Wo_pad, (acc_budget // (4 * Cout_blk)) // _LANE * _LANE)
    T = max(1, min(Ho, tw_lanes // Wo_pad))
    n_row = -(-Ho // T)
    return T, n_row


def _vmem_limit_bytes(resident_bytes):
    cap = 64 * 1024 * 1024               # conservative (v7x) fallback
    try:
        cap = int(pltpu.get_tpu_info().vmem_capacity_bytes)
    except Exception:
        pass
    need = 2 * resident_bytes + (4 << 20)      # resident blocks are double-buffered
    return int(max(32 << 20, min(need, (cap * 3) // 4, 100 << 20)))


# ----------------------------------------------------------------------------
# Pallas kernel: fused stride-2 conv + InstanceNorm for one (sample, Cout tile).
# ----------------------------------------------------------------------------
def _make_convblock_kernel(Cin, Cout_blk, Ho, Wo, Wo_pad, T, n_row, need_mask):
    TW = T * Wo_pad
    K2 = 3 * Cin
    inv_hw = 1.0 / float(Ho * Wo)

    def kernel(xd_ref, w1_ref, w2_ref, mask_ref, o_ref, sum_ref, sq_ref):
        # xd_ref  : (1, 6*Cin, (Ho_pad+1)*Wo_pad)  resident per sample
        # w1_ref  : (Cout_blk, 6*Cin)              ky in {0,1}
        # w2_ref  : (Cout_blk, 3*Cin)              ky == 2 (input shifted by +Wo_pad)
        # mask_ref: (1, TW)                        1.0 on valid (oy<Ho, wo<Wo) lanes
        # o_ref   : (1, Cout_blk, Ho_pad*Wo_pad)   resident per (sample, Cout tile)
        r = pl.program_id(2)
        col0 = pl.multiple_of(r * TW, _LANE)
        col1 = pl.multiple_of(r * TW + Wo_pad, _LANE)

        # Conv: 2 accumulated MXU matmuls with the taps folded into the contraction.
        y = jnp.dot(w1_ref[...], xd_ref[0, :, pl.ds(col0, TW)],
                    preferred_element_type=jnp.float32)
        y = y + jnp.dot(w2_ref[...], xd_ref[0, pl.ds(0, K2), pl.ds(col1, TW)],
                        preferred_element_type=jnp.float32)

        # InstanceNorm statistics from registers, masked to the valid spatial region.
        ym = y * mask_ref[...] if need_mask else y
        tile_sum = jnp.sum(ym, axis=1, keepdims=True)
        tile_sq = jnp.sum(ym * y, axis=1, keepdims=True)

        if n_row == 1:
            # Whole sample in registers: normalize and store once (lane-dense vst).
            mean = tile_sum * inv_hw
            var = jnp.maximum(tile_sq * inv_hw - mean * mean, 0.0)
            o_ref[0] = ((y - mean) * jax.lax.rsqrt(var + EPS)).astype(o_ref.dtype)
        else:
            @pl.when(r == 0)
            def _():
                sum_ref[...] = jnp.zeros_like(sum_ref)
                sq_ref[...] = jnp.zeros_like(sq_ref)

            sum_ref[...] += tile_sum
            sq_ref[...] += tile_sq
            o_ref[0, :, pl.ds(col0, TW)] = y.astype(o_ref.dtype)

            # Apply-only epilogue: stream the resident output block tile by tile.
            @pl.when(r == n_row - 1)
            def _():
                mean = sum_ref[...] * inv_hw
                # NOTE: single-pass E[y^2]-mean^2 (clamped at 0); accepted trade-off
                # vs. a second stats pass — fine for zero-ish-mean conv outputs.
                var = jnp.maximum(sq_ref[...] * inv_hw - mean * mean, 0.0)
                scale = jax.lax.rsqrt(var + EPS)

                def apply(t, carry):
                    c0 = pl.multiple_of(t * TW, _LANE)
                    blk = o_ref[0, :, pl.ds(c0, TW)].astype(jnp.float32)
                    o_ref[0, :, pl.ds(c0, TW)] = ((blk - mean) * scale).astype(o_ref.dtype)
                    return carry

                jax.lax.fori_loop(0, n_row, apply, 0)

    return kernel


def conv_block(x, w, *, compute_dtype=jnp.bfloat16, acc_budget_bytes=_ACC_BUDGET):
    """One ConvBlock: Conv2d(3x3, stride=2, pad=1; bias elided — it cancels under
    InstanceNorm(affine=False)) + InstanceNorm2d.  x: (N,Cin,H,W), w: (Cout,Cin,3,3).
    Returns (N, Cout, Ho, Wo) in compute_dtype."""
    assert x.ndim == 4
    N, Cin, H, W = x.shape
    Cout = w.shape[0]
    Ho, Wo = (H + 1) // 2, (W + 1) // 2
    Wo_pad = _round_up(Wo, _LANE)
    out_bytes = jnp.dtype(compute_dtype).itemsize

    n_co, Cout_blk = _choose_cout_split(Cout, N, Ho * Wo_pad, out_bytes)
    T, n_row = _choose_row_tile(Ho, Wo_pad, Cout_blk, acc_budget_bytes)
    Ho_pad = n_row * T
    TW = T * Wo_pad
    HW_pad = Ho_pad * Wo_pad
    Lrow = (Ho_pad + 1) * Wo_pad
    need_mask = (Wo_pad != Wo) or (Ho_pad != Ho)

    xd = _deinterleave(x, Ho_pad, Wo_pad, compute_dtype)     # (N, 6*Cin, Lrow)
    w01, w2 = _pack_weights(w, compute_dtype)

    # Validity mask over the padded spatial layout (shared across batch/channels).
    oy = jnp.arange(Ho_pad)[:, None]
    ox = jnp.arange(Wo_pad)[None, :]
    mask = ((oy < Ho) & (ox < Wo)).astype(jnp.float32).reshape(1, HW_pad)

    resident = ((6 * Cin * Lrow + Cout_blk * HW_pad + 9 * Cout_blk * Cin) * out_bytes
                + TW * 4)
    vmem_limit = _vmem_limit_bytes(resident)

    kernel = _make_convblock_kernel(Cin, Cout_blk, Ho, Wo, Wo_pad, T, n_row, need_mask)

    out = pl.pallas_call(
        kernel,
        out_shape=jax.ShapeDtypeStruct((N, Cout, HW_pad), compute_dtype),
        grid=(N, n_co, n_row),
        in_specs=[
            # whole-sample de-interleaved input, resident across (co, r)
            pl.BlockSpec((1, 6 * Cin, Lrow), lambda n, c, r: (n, 0, 0)),
            # weight groups, resident per Cout tile
            pl.BlockSpec((Cout_blk, 6 * Cin), lambda n, c, r: (c, 0)),
            pl.BlockSpec((Cout_blk, 3 * Cin), lambda n, c, r: (c, 0)),
            # per-row-tile validity mask
            pl.BlockSpec((1, TW), lambda n, c, r: (0, r)),
        ],
        # whole-(sample, Cout tile) lane-dense output, resident across row tiles
        out_specs=pl.BlockSpec((1, Cout_blk, HW_pad), lambda n, c, r: (n, c, 0)),
        scratch_shapes=[pltpu.VMEM((Cout_blk, 1), jnp.float32),    # IN sum
                        pltpu.VMEM((Cout_blk, 1), jnp.float32)],   # IN sum of squares
        compiler_params=pltpu.CompilerParams(
            dimension_semantics=("parallel", "parallel", "arbitrary"),
            vmem_limit_bytes=vmem_limit),
    )(xd, w01, w2, mask)

    out = out.reshape(N, Cout, Ho_pad, Wo_pad)[:, :, :Ho, :Wo]
    return out


# ----------------------------------------------------------------------------
# Module-level forward + params (UnetEncoder semantics).
# ----------------------------------------------------------------------------
def init_unet_encoder_params(key, n_layers, in_cha, min_cha, max_cha, k=3):
    params = []
    cha_in, cha_out = in_cha, min_cha
    for _ in range(n_layers):
        key, kw, kb = jax.random.split(key, 3)
        fan_in = cha_in * k * k
        bound = 1.0 / jnp.sqrt(fan_in)
        w = jax.random.uniform(kw, (cha_out, cha_in, k, k), jnp.float32, -bound, bound)
        b = jax.random.uniform(kb, (cha_out,), jnp.float32, -bound, bound)
        params.append((w, b))
        cha_in = cha_out
        cha_out = min(2 * cha_out, max_cha)
    return params


def unet_encoder_forward(x, params, *, compute_dtype=jnp.bfloat16,
                         acc_budget_bytes=_ACC_BUDGET):
    """Returns the list of caches (one per ConvBlock), like the PyTorch module."""
    assert x.ndim == 4
    caches = []
    for (w, _b) in params:   # bias ignored: cancels under InstanceNorm(affine=False)
        x = conv_block(x, w, compute_dtype=compute_dtype,
                       acc_budget_bytes=acc_budget_bytes)
        caches.append(x)
    return caches


# ---- pure-JAX reference (correctness check only; keeps the conv bias) ----
def _ref_conv_block(x, w, b):
    y = jax.lax.conv_general_dilated(
        x, w, window_strides=(2, 2), padding=[(1, 1), (1, 1)],
        dimension_numbers=('NCHW', 'OIHW', 'NCHW'))
    y = y + b.reshape(1, -1, 1, 1)
    mean = jnp.mean(y, axis=(2, 3), keepdims=True)
    var = jnp.mean(jnp.square(y - mean), axis=(2, 3), keepdims=True)
    return (y - mean) * jax.lax.rsqrt(var + EPS)


def _ref_forward(x, params):
    caches = []
    for (w, b) in params:
        x = _ref_conv_block(x, w, b)
        caches.append(x)
    return caches


def _check(caches, refs, atol, rtol):
    caches = [jax.block_until_ready(c) for c in caches]
    for c, r in zip(caches, refs):
        assert c.shape == r.shape, (c.shape, r.shape)
        err = float(jnp.max(jnp.abs(c.astype(jnp.float32) - r)))
        assert jnp.allclose(c.astype(jnp.float32), r, atol=atol, rtol=rtol), err


if __name__ == "__main__":
    key = jax.random.PRNGKey(0)
    k_in, k_par = jax.random.split(key)

    # UnetEncoder(n_layers=3, in_cha=4, min_cha=8, max_cha=32) on (2, 4, 16, 16)
    n_layers, in_cha, min_cha, max_cha = 3, 4, 8, 32
    x = jax.random.normal(k_in, (2, in_cha, 16, 16), jnp.float32)
    params = init_unet_encoder_params(k_par, n_layers, in_cha, min_cha, max_cha)

    refs = _ref_forward(x, params)
    refs1 = _ref_forward(x[:1], params)

    # 1) f32 compute path, single-row-tile fast path: tight check vs. reference.
    _check(unet_encoder_forward(x, params, compute_dtype=jnp.float32),
           refs, atol=2e-3, rtol=2e-3)

    # 2) f32 path with tiny row-tile budget: exercises the multi-tile masked-stats
    #    accumulation + streamed apply-only epilogue.
    _check(unet_encoder_forward(x, params, compute_dtype=jnp.float32,
                                acc_budget_bytes=4096),
           refs, atol=2e-3, rtol=2e-3)

    # 3) f32 path with N == 1: exercises the Cout-split ("parallel") grid axis.
    _check(unet_encoder_forward(x[:1], params, compute_dtype=jnp.float32,
                                acc_budget_bytes=4096),
           refs1, atol=2e-3, rtol=2e-3)

    # 4) bf16 MXU fast path (default): tolerance reflects bf16 activation quantization.
    _check(unet_encoder_forward(x, params), refs, atol=1e-1, rtol=1e-1)

    print("KERNEL_OK")
</pallas_src>

<mosaic_0001>
module attributes {stable_mosaic.version = 11 : i64} {
  func.func @kernel(%arg0: i32, %arg1: i32, %arg2: i32, %arg3: memref<1x24x1152xf32, #tpu.memory_space<vmem>>, %arg4: memref<8x24xf32, #tpu.memory_space<vmem>>, %arg5: memref<8x12xf32, #tpu.memory_space<vmem>>, %arg6: memref<1x1024xf32, #tpu.memory_space<vmem>>, %arg7: memref<1x8x1024xf32, #tpu.memory_space<vmem>>, %arg8: memref<8x1xf32, #tpu.memory_space<vmem>>, %arg9: memref<8x1xf32, #tpu.memory_space<vmem>>) attributes {dimension_semantics = [#tpu.dimension_semantics<parallel>, #tpu.dimension_semantics<parallel>, #tpu.dimension_semantics<arbitrary>], iteration_bounds = array<i64: 2, 1, 1>, scalar_prefetch = 0 : i64, scratch_operands = 2 : i64, tpu.core_type = #tpu.core_type<tc>, window_params = [{transform_indices = @transform_0, window_bounds = array<i64: 1, 24, 1152>}, {transform_indices = @transform_1, window_bounds = array<i64: 8, 24>}, {transform_indices = @transform_2, window_bounds = array<i64: 8, 12>}, {transform_indices = @transform_3, window_bounds = array<i64: 1, 1024>}, {transform_indices = @transform_4, window_bounds = array<i64: 1, 8, 1024>}]} {
    %c1024_i32 = arith.constant 1024 : i32
    %0 = arith.muli %arg2, %c1024_i32 : i32
    %1 = tpu.assume_multiple %0, 128 : i32
    %c1024_i32_0 = arith.constant 1024 : i32
    %2 = arith.muli %arg2, %c1024_i32_0 : i32
    %c128_i32 = arith.constant 128 : i32
    %3 = arith.addi %2, %c128_i32 : i32
    %4 = tpu.assume_multiple %3, 128 : i32
    %c0 = arith.constant 0 : index
    %c0_1 = arith.constant 0 : index
    %5 = vector.load %arg4[%c0, %c0_1] : memref<8x24xf32, #tpu.memory_space<vmem>>, vector<8x24xf32>
    %c0_2 = arith.constant 0 : index
    %c0_3 = arith.constant 0 : index
    %6 = arith.index_cast %1 : i32 to index
    %7 = vector.load %arg3[%c0_2, %c0_3, %6] : memref<1x24x1152xf32, #tpu.memory_space<vmem>>, vector<1x24x1024xf32>
    %8 = vector.shape_cast %7 : vector<1x24x1024xf32> to vector<24x1024xf32>
    %cst = arith.constant dense<0.000000e+00> : vector<8x1024xf32>
    %9 = tpu.matmul %5, %8, %cst {dimension_numbers = #tpu.dot_dimension_numbers<[1], [0], [0], [1], [0, 0, 1, 1], [], []>} : vector<8x24xf32>, vector<24x1024xf32>, vector<8x1024xf32> -> vector<8x1024xf32>
    %c0_4 = arith.constant 0 : index
    %c0_5 = arith.constant 0 : index
    %10 = vector.load %arg5[%c0_4, %c0_5] : memref<8x12xf32, #tpu.memory_space<vmem>>, vector<8x12xf32>
    %c0_6 = arith.constant 0 : index
    %c0_7 = arith.constant 0 : index
    %11 = arith.index_cast %4 : i32 to index
    %12 = vector.load %arg3[%c0_6, %c0_7, %11] : memref<1x24x1152xf32, #tpu.memory_space<vmem>>, vector<1x12x1024xf32>
    %13 = vector.shape_cast %12 : vector<1x12x1024xf32> to vector<12x1024xf32>
    %cst_8 = arith.constant dense<0.000000e+00> : vector<8x1024xf32>
    %14 = tpu.matmul %10, %13, %cst_8 {dimension_numbers = #tpu.dot_dimension_numbers<[1], [0], [0], [1], [0, 0, 1, 1], [], []>} : vector<8x12xf32>, vector<12x1024xf32>, vector<8x1024xf32> -> vector<8x1024xf32>
    %15 = arith.addf %9, %14 : vector<8x1024xf32>
    %c0_9 = arith.constant 0 : index
    %c0_10 = arith.constant 0 : index
    %16 = vector.load %arg6[%c0_9, %c0_10] : memref<1x1024xf32, #tpu.memory_space<vmem>>, vector<1x1024xf32>
    %17 = vector.broadcast %16 : vector<1x1024xf32> to vector<8x1024xf32>
    %18 = arith.mulf %15, %17 : vector<8x1024xf32>
    %cst_11 = arith.constant dense<0.000000e+00> : vector<8xf32>
    %19 = vector.multi_reduction <add>, %18, %cst_11 [1] : vector<8x1024xf32> to vector<8xf32>
    %20 = vector.shape_cast %19 : vector<8xf32> to vector<8x1xf32>
    %21 = arith.mulf %18, %15 : vector<8x1024xf32>
    %cst_12 = arith.constant dense<0.000000e+00> : vector<8xf32>
    %22 = vector.multi_reduction <add>, %21, %cst_12 [1] : vector<8x1024xf32> to vector<8xf32>
    %23 = vector.shape_cast %22 : vector<8xf32> to vector<8x1xf32>
    %cst_13 = arith.constant 1.562500e-02 : f32
    %24 = vector.broadcast %cst_13 : f32 to vector<8x1xf32>
    %25 = arith.mulf %20, %24 : vector<8x1xf32>
    %cst_14 = arith.constant 1.562500e-02 : f32
    %26 = vector.broadcast %cst_14 : f32 to vector<8x1xf32>
    %27 = arith.mulf %23, %26 : vector<8x1xf32>
    %28 = arith.mulf %25, %25 : vector<8x1xf32>
    %29 = arith.subf %27, %28 : vector<8x1xf32>
    %cst_15 = arith.constant 0.000000e+00 : f32
    %30 = vector.broadcast %cst_15 : f32 to vector<8x1xf32>
    %31 = arith.maximumf %29, %30 : vector<8x1xf32>
    %32 = vector.broadcast %25 : vector<8x1xf32> to vector<8x1024xf32>
    %33 = arith.subf %15, %32 : vector<8x1024xf32>
    %cst_16 = arith.constant 9.99999974E-6 : f32
    %34 = vector.broadcast %cst_16 : f32 to vector<8x1xf32>
    %35 = arith.addf %31, %34 : vector<8x1xf32>
    %36 = math.rsqrt %35 : vector<8x1xf32>
    %37 = vector.broadcast %36 : vector<8x1xf32> to vector<8x1024xf32>
    %38 = arith.mulf %33, %37 : vector<8x1024xf32>
    %c0_17 = arith.constant 0 : index
    %c0_18 = arith.constant 0 : index
    %c0_19 = arith.constant 0 : index
    %39 = vector.load %arg7[%c0_17, %c0_18, %c0_19] : memref<1x8x1024xf32, #tpu.memory_space<vmem>>, vector<1x8x1024xf32>
    %40 = vector.shape_cast %39 : vector<1x8x1024xf32> to vector<8x1024xf32>
    %41 = vector.shape_cast %38 : vector<8x1024xf32> to vector<1x8x1024xf32>
    tpu.vector_store %arg7[%c0_17, %c0_18, %c0_19], %41 {strides = array<i32>} : memref<1x8x1024xf32, #tpu.memory_space<vmem>>, vector<1x8x1024xf32>,
    return
  }
  func.func @transform_0(%arg0: i32, %arg1: i32, %arg2: i32) -> (i32, i32, i32) {
    %c0_i32 = arith.constant 0 : i32
    %c0_i32_0 = arith.constant 0 : i32
    %c0_i32_1 = arith.constant 0 : i32
    return %arg0, %c0_i32, %c0_i32_0 : i32, i32, i32
  }
  func.func @transform_1(%arg0: i32, %arg1: i32, %arg2: i32) -> (i32, i32) {
    %c0_i32 = arith.constant 0 : i32
    %c0_i32_0 = arith.constant 0 : i32
    return %arg1, %c0_i32 : i32, i32
  }
  func.func @transform_2(%arg0: i32, %arg1: i32, %arg2: i32) -> (i32, i32) {
    %c0_i32 = arith.constant 0 : i32
    %c0_i32_0 = arith.constant 0 : i32
    return %arg1, %c0_i32 : i32, i32
  }
  func.func @transform_3(%arg0: i32, %arg1: i32, %arg2: i32) -> (i32, i32) {
    %c0_i32 = arith.constant 0 : i32
    %c0_i32_0 = arith.constant 0 : i32
    return %c0_i32, %arg2 : i32, i32
  }
  func.func @transform_4(%arg0: i32, %arg1: i32, %arg2: i32) -> (i32, i32, i32) {
    %c0_i32 = arith.constant 0 : i32
    %c0_i32_0 = arith.constant 0 : i32
    return %arg0, %arg1, %c0_i32 : i32, i32, i32
  }
}

</mosaic_0001>

<bundles_post_ra>
// kernel: tpu_custom_call.1
= control target key start
LH: loop header
LB: loop body
LE: loop exit
PB: predicated region body
PF: predicated region fallthrough
CT: control target
= control target key end

     0   :  { %s1866_s0 = inlined_call_operand.hbm [shape: f32[2,24,1152], index: 0, kind: input, shape index: {}]   ;;  %s1867_s1 = inlined_call_operand.hbm [shape: f32[8,24], index: 1, kind: input, shape index: {}]   ;;  %s1868_s2 = inlined_call_operand.hbm [shape: f32[8,12], index: 2, kind: input, shape index: {}]   ;;  %s1869_s3 = inlined_call_operand.hbm [shape: f32[1,1024], index: 3, kind: input, shape index: {}]   ;;  %s1870_s4 = inlined_call_operand.hbm [shape: f32[2,8,1024], index: 4, kind: output, shape index: {}]  }
   0x1   :  { %1875 = sst [smem:[#allocation17_spill]] %s1867_s1 }
   0x2   :  { %1876 = sst [smem:[#allocation18_spill]] %s1868_s2 }
   0x3   :  { %9 = vsyncpa [#allocation5], 0 }
   0x4   :  { %11 = vsyncpa [#allocation5 + $0x1], 0 }
   0x5   :  { %12 = vsyncpa [#allocation8], 0 }
   0x6   :  { %13 = vsyncpa [#allocation11], 0 }
   0x7   :  { %14 = vsyncpa [#allocation6], 0 }
   0x8   :  { %16 = vsyncpa [#allocation6 + $0x1], 0  ;;  %s1579_s15 = smov 0   ;;  %s1581_s16 = smov 0  }
   0x9   :  { %s1583_s17 = smov 0   ;;  %s1585_s18 = smov 0  }
   0xa   :  { %s1587_s19 = smov 0   ;;  %s1589_s20 = smov 0  }
   0xb LB: > { %s1198_s21 = sadd.s32 4294967295, %s1544_s20   ;;  %s1199_s22 = sadd.s32 4294967294, %s1544_s20   ;;  %s1544_s20 = sphi %s1589_s20, %s22_s20   ;;  %s1540_s19 = sphi %s1587_s19, %s1897_s19   ;;  %s1536_s18 = sphi %s1585_s18, %s1896_s18   ;;  %s1532_s17 = sphi %s1583_s17, %s1895_s17   ;;  %s1528_s16 = sphi %s1581_s16, %s1894_s16   ;;  %s1524_s15 = sphi %s1579_s15, %s1893_s15  }
   0xc   : > { %p61_p0 = scmp.ne.s32.totalorder %s1528_s16, %s1524_s15  ;;  %p1613_p1 = scmp.eq.s32.totalorder %s1198_s21, 0 }
   0xd   : > { %p1617_p2 = scmp.eq.s32.totalorder %s1198_s21, 1  ;;  %p171_p3 = scmp.eq.s32.totalorder %s1199_s22, 1 }
   0xe   : > { %s1877_s23 = scalar_select %p1613_p1, 1, 0 }
   0xf   : > { %s1878_s24 = scalar_select %p1617_p2, 1, 0 }
  0x10   : > { %p1623_p4 = por %p1613_p1, %p61_p0  ;;  %p1200_p5 = scmp.ge.s32.totalorder %s1544_s20, 1 }
  0x11   : > { %p1628_p6 = por %p171_p3, %p61_p0  ;;  %p178_p7 = scmp.lt.s32.totalorder %s1544_s20, 3 }
  0x12   : > { %s1879_s25 = scalar_select %p1623_p4, 1, 0 }
  0x13   : > { %s1880_s26 = scalar_select %p1628_p6, 1, 0 }
  0x14   : > { %p1633_p8 = pnand %p1200_p5, %p178_p7  ;;  %s1546_s28 = smov [#allocation7]  }
  0x15   : > { %s193_s29 = sshll.u32 %s1546_s28, 4  ;;  %s1547_s30 = smov [#allocation9]   ;;  %s194_s29 = int_to_ptr.vmem [resolvable:$true] %s193_s29 }
  0x16   : > { %s1881_s27 = scalar_select %p1633_p8, 1, 0 }
  0x17   : > { %p1268_p10 = pneg %p1633_p8  ;;  %s206_s5 = sshll.u32 %s1547_s30, 4  ;;  %s207_s5 = int_to_ptr.vmem [resolvable:$true] %s206_s5 }
  0x18   : > { %s1548_s7 = smov [#allocation10]   ;;  %s1361_s9 = scalar_lea.vmem %s194_s29, 128 }
  0x19   : > { %p1642_p11 = pnand %p1268_p10, %p1613_p1  ;;  %s220_s8 = sshll.u32 %s1548_s7, 4  ;;  %s1646_s8 = int_to_ptr.vmem [resolvable:$true] %s220_s8 }
  0x1a   : > { %p1362_p13 = scmp.ne.s32.totalorder %s194_s29, %s1361_s9  ;;  %p1369_p5 = scmp.lt.s32.totalorder %s194_s29, %s194_s29 }
  0x1b   : > { %p1352_p12 = pneg %p1642_p11  ;;  %p1370_p7 = scmp.lt.s32.totalorder %s1361_s9, %s1361_s9 }
  0x1d   : > { %p1364_p0 = pnand %p1362_p13, %p1352_p12  ;;  %p1371_p10 = por %p1370_p7, %p1369_p5 }
  0x1f   : > { %p1365_p3 = pneg %p1364_p0 }
  0x21   : > { %p1372_p9 = pnand %p1371_p10, %p1365_p3 }
  0x23   : > { %1375 = shalt.err (!%p1372_p9)
}
  0x24   : > { %s1883_s1 = sld [smem:[#allocation17_spill]]  ;;  %s1387_s12 = scalar_lea.vmem %s207_s5, 128 }
  0x25   : > { %p1388_p6 = scmp.ne.s32.totalorder %s207_s5, %s1387_s12  ;;  %p1395_p13 = scmp.lt.s32.totalorder %s207_s5, %s207_s5 }
  0x26   : > { %p1396_p0 = scmp.lt.s32.totalorder %s1387_s12, %s1387_s12 }
  0x27   : > { %p1390_p1 = pnand %p1388_p6, %p1352_p12 }
  0x28   : > { %p1397_p8 = por %p1396_p0, %p1395_p13 }
  0x29   : > { %p1391_p4 = pneg %p1390_p1 }
  0x2a   : > { %1271 = dma.hbm_to_vmem [thread:$0]  (!%p1642_p11), %s1883_s1, 128, %s194_s29, [#allocation8]  }
  0x2b   : > { %p1398_p2 = pnand %p1397_p8, %p1391_p4 }
  0x2d   : > { %1401 = shalt.err (!%p1398_p2)
}
  0x2e   : > { %s1884_s2 = sld [smem:[#allocation18_spill]]  ;;  %s1413_s21 = scalar_lea.vmem %s1646_s8, 128 }
  0x2f   : > { %p1414_p9 = scmp.ne.s32.totalorder %s1646_s8, %s1413_s21  ;;  %p1421_p3 = scmp.lt.s32.totalorder %s1646_s8, %s1646_s8 }
  0x30   : > { %p1422_p4 = scmp.lt.s32.totalorder %s1413_s21, %s1413_s21 }
  0x31   : > { %p1416_p1 = pnand %p1414_p9, %p1352_p12 }
  0x32   : > { %p1423_p2 = por %p1422_p4, %p1421_p3 }
  0x33   : > { %p1417_p6 = pneg %p1416_p1 }
  0x34   : > { %1274 = dma.hbm_to_vmem [thread:$0]  (!%p1642_p11), %s1884_s2, 128, %s207_s5, [#allocation8]  }
  0x35   : > { %p1424_p8 = pnand %p1423_p2, %p1417_p6 }
  0x37   : > { %1427 = shalt.err (!%p1424_p8)
}
  0x38   : > { %1277 = dma.hbm_to_vmem [thread:$0]  (!%p1642_p11), %s1869_s3, 128, %s1646_s8, [#allocation11]  }
  0x39   : > { %s48_s29 = sadd.s32 1, %s1532_s17  ;;  %s41_s30 = sadd.s32 1, %s1540_s19 }
  0x3a   : > { %p55_p12 = scmp.ne.s32.totalorder %s1532_s17, %s1528_s16  ;;  %p43_p5 = scmp.ge.s32.totalorder %s41_s30, 2 }
  0x3b   : > { %p56_p7 = scmp.eq.s32.totalorder %s1544_s20, 0  ;;  %p1885_p10 = scmp.ne.s32.totalorder %s1878_s24, 0 }
  0x3c   : > { %p1289_p0 = scmp.lt.s32.totalorder %s1544_s20, 2  ;;  %s1899_s30 = smov (%p43_p5, %s41_s30), 0 }
  0x3d   : > { %p1686_p13 = por %p1885_p10, %p55_p12  ;;  %p57_p9 = por %p56_p7, %p55_p12 }
  0x3e   : > { %s231_s6 = sand.u32 1, %s1532_s17   ;;  %s45_s7 = ssub.s32 %s1540_s19, %s1899_s30 }
  0x3f   : > { %p46_p1 = scmp.eq.s32.totalorder %s45_s7, 0  ;;  %s1249_s8 = smul.u32 216, %s231_s6 }
  0x40   : > { %s1250_s9 = smul.u32 3456, %s1540_s19  ;;  %p1697_p11 = pnand %p1289_p0, %p57_p9 }
  0x41   : > { %s1702_s24 = scalar_select %p46_p1, %s1532_s17, %s48_s29  }
  0x42   : > { %s241_s13 = scalar_lea.hbm %s1866_s0, %s1250_s9  ;;  %s235_s14 = scalar_lea.vmem [#allocation4], %s1249_s8 }
  0x43   : > { %s242_s21 = sshll.u32 %s235_s14, 4  ;;  %s232_s22 = scalar_lea.sflag [#allocation5], %s231_s6  ;;  %s243_s21 = int_to_ptr.vmem [resolvable:$true] %s242_s21 }
  0x44   : > { %p1430_p6 = pneg %p1697_p11  ;;  %s1441_s28 = scalar_lea.vmem %s243_s21, 3456 }
  0x45   : > { %p1442_p3 = scmp.ne.s32.totalorder %s243_s21, %s1441_s28  ;;  %s1549_s7 = smov [#allocation4]  }
  0x46   : > { %s1446_s1 = sshll.u32 %s1549_s7, 4  ;;  %s1447_s1 = int_to_ptr.vmem [resolvable:$false] %s1446_s1 }
  0x47   : > { %p1444_p4 = pnand %p1442_p3, %p1430_p6  ;;  %s1448_s2 = scalar_lea.vmem %s1447_s1, 6912 }
  0x48   : > { %p1449_p8 = scmp.lt.s32.totalorder %s243_s21, %s1447_s1  ;;  %p1450_p12 = scmp.lt.s32.totalorder %s1448_s2, %s1441_s28 }
  0x49   : > { %p1445_p2 = pneg %p1444_p4 }
  0x4a   : > { %p1451_p5 = por %p1450_p12, %p1449_p8 }
  0x4c   : > { %p1452_p7 = pnand %p1451_p5, %p1445_p2 }
  0x4e   : > { %1455 = shalt.err (!%p1452_p7)
}
  0x4f   : > { %s1550_s29 = smov 1152   ;;  %s1551_s8 = smov 72  }
  0x50   : > { %1281 = dma.hbm_to_vmem [thread:$0]  (!%p1697_p11), %s241_s13, 3456, %s243_s21, %s232_s22, %s1550_s29, %s1550_s29, %s1551_s8  }
  0x51   : > { %p1888_p10 = scmp.ne.s32.totalorder %s1881_s27, 0 }
  0x52   : > { %s1714_s6 = sand.u32 (!%p1888_p10), 1, %s1528_s16   ;;  %p1889_p0 = scmp.ne.s32.totalorder (!%p1888_p10), %s1879_s25, 0 }
  0x53   : > { %254 = sbr.rel (%p1888_p10) target bundleno = 509 (0x1fd), region = 36  ;;  %s257_s1 = scalar_lea.sflag (!%p1888_p10), [#allocation5], %s1714_s6 }
  0x54   : > { %s1251_s9 = smul.u32 (!%p1888_p10), 216, %s1714_s6 }
  0x56   : > { %s1718_s2 = scalar_lea.vmem (!%p1888_p10), [#allocation4], %s1251_s9 }
  0x58   : > { %1507 = dma.done.wait (%p1889_p0), %s257_s1, 3456  }
  0x59   : > { %1509 = vsyncadd (%p1889_p0), %s257_s1, 4294963840  ;;  %p1890_p9 = scmp.ne.s32.totalorder %s1877_s23, 0 }
  0x5b   : > { %1511 = dma.done.wait (%p1890_p9), [#allocation8], 256  }
  0x5c   : > { %1513 = vsyncadd (%p1890_p9), [#allocation8], 4294967040 }
  0x5d   : > { %1515 = dma.done.wait (%p1890_p9), [#allocation11], 128  }
  0x5e   : > { %1517 = vsyncadd (%p1890_p9), [#allocation11], 4294967168  ;;  %v1552_v0 = vmov 0.0   ;;  %vm354_vm0 = vcmask 1043456   ;;  %v1220_v1 = vld [vmem:[%s1718_s2 + $0x58] sm:$0xf]  ;;  %v953_v38 = vlaneseq }
  0x5f   : > { %443 = vmatprep.mubr.f32.mxu0 %v1552_v0  ;;  %514 = vmatprep.mubr.f32.mxu1 %v1552_v0  ;;  %v1222_v2 = vld [vmem:[%s1718_s2 + $0x68] sm:$0xf]  ;;  %v1219_v3 = vld [vmem:[%s1718_s2 + $0x50] sm:$0xf]  ;;  %v1221_v4 = vld [vmem:[%s1718_s2 + $0x60] sm:$0xf] }
  0x60   : > { %1227 = vmatprep.subr.msk.mxu0 %vm354_vm0, %v1220_v1  ;;  %1230 = vmatprep.subr.msk.mxu1 %vm354_vm0, %v1222_v2  ;;  %v1212_v5 = vld [vmem:[%s1718_s2 + $0x10] sm:$0xff]  ;;  %v1742_v6 = vld [vmem:[%s1718_s2 + $0x20] sm:$0xff]  ;;  %v1211_v7 = vld [vmem:[%s1718_s2 + $0x8] sm:$0xff]  ;;  %vm350_vm1 = vcmask 97280   ;;  %vm663_vm2 = vcmask 195584   ;;  %v954_v41 = vshrl.u32 %v953_v38, 7 }
  0x61   : > { %1228 = vmatpush1.msk.msra.mxu0 %vm354_vm0, %v1219_v3  ;;  %1231 = vmatpush1.msk.msra.mxu1 %vm354_vm0, %v1221_v4  ;;  %v1213_v8 = vld [vmem:[%s1718_s2 + $0x18] sm:$0xff]  ;;  %v1226_v11 = vld [vmem:[%s1718_s2 + $0x88] sm:$0xf]  ;;  %v1223_v12 = vld [vmem:[%s1718_s2 + $0x70] sm:$0xf]  ;;  %s1210_s23 = sshll.u32 %s1714_s6, 6 }
  0x62   : > { %v329_v9 = vld [vmem:[#allocation9] sm:$0xff]  ;;  %409 = vmatprep.subr.mxu0 %v1212_v5  ;;  %480 = vmatprep.subr.mxu1 %v1742_v6  ;;  %v1216_v14 = vld [vmem:[%s1718_s2 + $0x30] sm:$0xff]  ;;  %v1215_v16 = vld [vmem:[%s1718_s2 + $0x28] sm:$0xff]  ;;  %v955_v44 = vsub.s32 0, %v954_v41  ;;  %v963_v47 = vsub.s32 2, %v954_v41  ;;  %v959_v48 = vsub.s32 1, %v954_v41 }
  0x63   : > { %v1224_v10 = vld [vmem:[%s1718_s2 + $0x78] sm:$0xf]  ;;  %410 = vmatpush1.msra.mxu0 %v1211_v7  ;;  %481 = vmatpush1.msra.mxu1 %v1213_v8  ;;  %v1225_v13 = vld [vmem:[%s1718_s2 + $0x80] sm:$0xf]  ;;  %v324_v19 = vld [vmem:[%s1718_s2 + $0xa8] sm:$0xff]  ;;  %v967_v50 = vsub.s32 3, %v954_v41 }
  0x64   : > { %1229 = vmatmul.mubr.msk.f32.vlgmr.msra.gmra.mxu0 %vm350_vm1, %v329_v9  ;;  %1233 = vmatprep.subr.msk.mxu0 %vm354_vm0, %v1224_v10  ;;  %v1218_v15 = vld [vmem:[%s1718_s2 + $0x40] sm:$0xff]  ;;  %v1217_v17 = vld [vmem:[%s1718_s2 + $0x38] sm:$0xff]  ;;  %v321_v20 = vld [vmem:[%s1718_s2 + $0x90] sm:$0xff]  ;;  %v975_v2 = vsub.s32 5, %v954_v41  ;;  %v979_v3 = vsub.s32 6, %v954_v41  ;;  %s1248_s25 = sshll.u32 %s1536_s18, 10 }
  0x65   : > { %1236 = vmatprep.subr.msk.mxu1 %vm354_vm0, %v1226_v11  ;;  %1232 = vmatmul.mubr.msk.f32.vlgmr.msra.gmra.mxu1 %vm350_vm1, %v329_v9  ;;  %v322_v18 = vld [vmem:[%s1718_s2 + $0x98] sm:$0xff]  ;;  %v323_v21 = vld [vmem:[%s1718_s2 + $0xa0] sm:$0xff]  ;;  %v314_v22 = vld [vmem:[%s1718_s2 + $0x50] sm:$0xff]  ;;  %s296_s27 = scalar_lea.vmem [#allocation12], %s1210_s23  ;;  %s1818_s18 = scalar_lea.hbm %s1870_s4, %s1248_s25 }
  0x66   : > { %1234 = vmatpush1.msk.msra.mxu0 %vm354_vm0, %v1223_v12  ;;  %1237 = vmatpush1.msk.msra.mxu1 %vm354_vm0, %v1225_v13  ;;  %v316_v23 = vld [vmem:[%s1718_s2 + $0x60] sm:$0xff]  ;;  %v313_v24 = vld [vmem:[%s1718_s2 + $0x48] sm:$0xff]  ;;  %v315_v25 = vld [vmem:[%s1718_s2 + $0x58] sm:$0xff]  ;;  %s1075_s10 = sshll.u32 %s296_s27, 4  ;;  %s1059_s13 = scalar_lea.sflag [#allocation6], %s1714_s6  ;;  %s1820_s10 = int_to_ptr.vmem [resolvable:$true] %s1075_s10 }
  0x67   : > { %551 = vmatprep.subr.mxu0 %v1216_v14  ;;  %622 = vmatprep.subr.mxu1 %v1218_v15  ;;  %v305_v26 = vld [vmem:[%s1718_s2] sm:$0xff]  ;;  %v300_v27 = vld [vmem:[#allocation7] sm:$0xff]  ;;  %v328_v29 = vld [vmem:[%s1718_s2 + $0xc8] sm:$0xff]  ;;  %v983_v15 = vsub.s32 7, %v954_v41  ;;  %s1456_s14 = scalar_lea.vmem %s1820_s10, 1024  ;;  %s1553_s21 = smov [#allocation12]  }
  0x68   : > { %552 = vmatpush1.msra.mxu0 %v1215_v16  ;;  %585 = vmatprep.mubr.f32.mxu0 %v1552_v0  ;;  %v326_v28 = vld [vmem:[%s1718_s2 + $0xb8] sm:$0xff]  ;;  %v325_v30 = vld [vmem:[%s1718_s2 + $0xb0] sm:$0xff]  ;;  %v327_v31 = vld [vmem:[%s1718_s2 + $0xc0] sm:$0xff]  ;;  %p1457_p1 = scmp.ne.s32.totalorder %s1820_s10, %s1456_s14  ;;  %s1460_s22 = sshll.u32 %s1553_s21, 4  ;;  %s1461_s22 = int_to_ptr.vmem [resolvable:$false] %s1460_s22 }
  0x69   : > { %623 = vmatpush1.msra.mxu1 %v1217_v17  ;;  %1235 = vmatmul.mubr.msk.f32.vlgmr.msra.gmra.mxu0 %vm350_vm1, %v329_v9  ;;  %v318_v32 = vld [vmem:[%s1718_s2 + $0x70] sm:$0xff]  ;;  %v320_v33 = vld [vmem:[%s1718_s2 + $0x80] sm:$0xff]  ;;  %v317_v34 = vld [vmem:[%s1718_s2 + $0x68] sm:$0xff]  ;;  %s1462_s28 = scalar_lea.vmem %s1461_s22, 2048  ;;  %p1463_p3 = scmp.lt.s32.totalorder %s1820_s10, %s1461_s22 }
  0x6a   : > { %656 = vmatprep.mubr.f32.mxu1 %v1552_v0  ;;  %693 = vmatprep.subr.mxu0 %v322_v18  ;;  %v319_v35 = vld [vmem:[%s1718_s2 + $0x78] sm:$0xff]  ;;  %v951_v46 = vld [vmem:[#allocation10] sm:$0xff]  ;;  %p1458_p11 = pnand %p1457_p1, %p1686_p13  ;;  %p1464_p4 = scmp.lt.s32.totalorder %s1462_s28, %s1456_s14 }
  0x6b   : > { %764 = vmatprep.subr.mxu1 %v324_v19  ;;  %1238 = vmatmul.mubr.msk.f32.vlgmr.msra.gmra.mxu1 %vm350_vm1, %v329_v9  ;;  %v956_v51 = vrot.slane %v951_v46, %v955_v44  ;;  %v964_v54 = vrot.slane %v951_v46, %v963_v47  ;;  %v960_v57 = vrot.slane %v951_v46, %v959_v48 }
  0x6c   : > { %694 = vmatpush1.msra.mxu0 %v321_v20  ;;  %765 = vmatpush1.msra.mxu1 %v323_v21  ;;  %v968_v60 = vrot.slane %v951_v46, %v967_v50  ;;  %v976_v13 = vrot.slane %v951_v46, %v975_v2  ;;  %p1459_p6 = pneg %p1458_p11  ;;  %p1465_p2 = por %p1464_p4, %p1463_p3 }
  0x6d   : > { %695 = vmatprep.subr.mxu0 %v314_v22  ;;  %766 = vmatprep.subr.mxu1 %v316_v23 }
  0x6e   : > { %696 = vmatpush1.msra.mxu0 %v313_v24  ;;  %767 = vmatpush1.msra.mxu1 %v315_v25  ;;  %p1466_p8 = pnand %p1465_p2, %p1459_p6 }
  0x6f   : > { %697 = vmatprep.subr.mxu0 %v1211_v7  ;;  %768 = vmatprep.subr.mxu1 %v1213_v8 }
  0x70   : > { %698 = vmatpush1.msra.mxu0 %v305_v26  ;;  %731 = vmatprep.mubr.f32.mxu0 %v1552_v0 }
  0x71   : > { %769 = vmatpush1.msra.mxu1 %v1212_v5  ;;  %802 = vmatprep.mubr.f32.mxu1 %v1552_v0 }
  0x72   : > { %1239 = vmatmul.mubr.msk.f32.vlgmr.msra.gmra.mxu0 %vm663_vm2, %v300_v27  ;;  %1240 = vmatmul.mubr.msk.f32.vlgmr.msra.gmra.mxu1 %vm663_vm2, %v300_v27 }
  0x73   : > { %835 = vmatprep.subr.mxu0 %v326_v28  ;;  %906 = vmatprep.subr.mxu1 %v328_v29  ;;  %v984_v28 = vrot.slane %v951_v46, %v983_v15 }
  0x74   : > { %836 = vmatpush1.msra.mxu0 %v325_v30  ;;  %907 = vmatpush1.msra.mxu1 %v327_v31 }
  0x75   : > { %837 = vmatprep.subr.mxu0 %v318_v32  ;;  %908 = vmatprep.subr.mxu1 %v320_v33 }
  0x76   : > { %838 = vmatpush1.msra.mxu0 %v317_v34  ;;  %909 = vmatpush1.msra.mxu1 %v319_v35 }
  0x77   : > { %839 = vmatprep.subr.mxu0 %v1215_v16  ;;  %910 = vmatprep.subr.mxu1 %v1217_v17 }
  0x78   : > { %840 = vmatpush1.msra.mxu0 %v1742_v6  ;;  %873 = vmatprep.mubr.f32.mxu0 %v1552_v0 }
  0x79   : > { %911 = vmatpush1.msra.mxu1 %v1216_v14  ;;  %944 = vmatprep.mubr.f32.mxu1 %v1552_v0  ;;  %v971_v0 = vsub.s32 4, %v954_v41  ;;  %v980_v14 = vrot.slane %v951_v46, %v979_v3 }
  0x7a   : > { %1241 = vmatmul.mubr.msk.f32.vlgmr.msra.gmra.mxu0 %vm663_vm2, %v300_v27  ;;  %1242 = vmatmul.mubr.msk.f32.vlgmr.msra.gmra.mxu1 %vm663_vm2, %v300_v27 }
  0x7b   : > { %v972_v9 = vrot.slane %v951_v46, %v971_v0 }
 0x124   : > { %v445_v36 = vpop.f32.mrf.mxu0 }
 0x125   : > { %v516_v37 = vpop.f32.mrf.mxu1 }
 0x126   : > { %v447_v40 = vpop.f32.mrf.mxu0 }
 0x127   : > { %v518_v39 = vpop.f32.mrf.mxu1 }
 0x129   : > { %v587_v43 = vpop.f32.mrf.mxu0 }
 0x12b   : > { %v658_v42 = vpop.f32.mrf.mxu1  ;;  %v589_v49 = vpop.f32.mrf.mxu0 }
 0x12d   : > { %v660_v45 = vpop.f32.mrf.mxu1 }
 0x132   : > { %v733_v52 = vpop.f32.mrf.mxu0  ;;  %v804_v53 = vpop.f32.mrf.mxu1 }
 0x133   : > { %v1793_v55 = vadd.f32 %v733_v52, %v445_v36  ;;  %v1795_v56 = vadd.f32 %v804_v53, %v516_v37 }
 0x134   : > { %v735_v58 = vpop.f32.mrf.mxu0  ;;  %v806_v59 = vpop.f32.mrf.mxu1 }
 0x135   : > { %v993_v61 = vmul.f32 %v956_v51, %v1793_v55  ;;  %v1798_v62 = vadd.f32 %v735_v58, %v447_v40  ;;  %v1800_v63 = vadd.f32 %v806_v59, %v518_v39  ;;  %v995_v1 = vmul.f32 %v964_v54, %v1795_v56 }
 0x137   : > { %v994_v4 = vmul.f32 %v960_v57, %v1798_v62  ;;  %v996_v5 = vmul.f32 %v968_v60, %v1800_v63  ;;  %v1010_v6 = vmul.f32 %v993_v61, %v1793_v55  ;;  %v1012_v10 = vmul.f32 %v995_v1, %v1795_v56 }
 0x139   : > { %v1001_v7 = vadd.f32 %v994_v4, %v993_v61  ;;  %v1011_v8 = vmul.f32 %v994_v4, %v1798_v62  ;;  %v1013_v20 = vmul.f32 %v996_v5, %v1800_v63 }
 0x13a   : > { %v875_v11 = vpop.f32.mrf.mxu0  ;;  %v946_v12 = vpop.f32.mrf.mxu1 }
 0x13b   : > { %v1018_v16 = vadd.f32 %v1011_v8, %v1010_v6  ;;  %v1002_v17 = vadd.f32 %v1001_v7, %v995_v1  ;;  %v876_v18 = vadd.f32 %v875_v11, %v587_v43  ;;  %v947_v19 = vadd.f32 %v946_v12, %v658_v42 }
 0x13c   : > { %v877_v21 = vpop.f32.mrf.mxu0  ;;  %v948_v22 = vpop.f32.mrf.mxu1 }
 0x13d   : > { %v1003_v23 = vadd.f32 %v1002_v17, %v996_v5  ;;  %v1019_v24 = vadd.f32 %v1018_v16, %v1012_v10  ;;  %v997_v25 = vmul.f32 %v972_v9, %v876_v18  ;;  %v878_v26 = vadd.f32 %v877_v21, %v589_v49 }
 0x13e   : > { %v949_v27 = vadd.f32 %v948_v22, %v660_v45  ;;  %v999_v29 = vmul.f32 %v980_v14, %v947_v19 }
 0x13f   : > { %v1020_v30 = vadd.f32 %v1019_v24, %v1013_v20  ;;  %v1014_v31 = vmul.f32 %v997_v25, %v876_v18  ;;  %v998_v32 = vmul.f32 %v976_v13, %v878_v26  ;;  %v1004_v33 = vadd.f32 %v1003_v23, %v997_v25 }
 0x140   : > { %v1000_v37 = vmul.f32 %v984_v28, %v949_v27  ;;  %v1016_v39 = vmul.f32 %v999_v29, %v947_v19 }
 0x141   : > { %v1021_v34 = vadd.f32 %v1020_v30, %v1014_v31  ;;  %v1015_v35 = vmul.f32 %v998_v32, %v878_v26  ;;  %v1005_v36 = vadd.f32 %v1004_v33, %v998_v32 }
 0x142   : > { %v1017_v43 = vmul.f32 %v1000_v37, %v949_v27 }
 0x143   : > { %v1006_v38 = vadd.f32 %v1005_v36, %v999_v29  ;;  %v1022_v40 = vadd.f32 %v1021_v34, %v1015_v35 }
 0x145   : > { %v1007_v41 = vadd.f32 %v1006_v38, %v1000_v37  ;;  %v1023_v42 = vadd.f32 %v1022_v40, %v1016_v39 }
 0x147   : > { %1008 = vadd.xlane.f32.xlu0 %v1007_v41  ;;  %v1024_v44 = vadd.f32 %v1023_v42, %v1017_v43 }
 0x14b   : > { %1025 = vadd.xlane.f32.xlu0 %v1024_v44 }
 0x1d0   : > { %v1009_v45 = vpop.xlane.xlu0 %1008 }
 0x1d1   : > { %v1027_v46 = vmul.f32 0.015625, %v1009_v45 }
 0x1d3   : > { %v1029_v48 = vmul.f32 %v1027_v46, %v1027_v46  ;;  %v1032_v53 = vsub.f32 %v1793_v55, %v1027_v46  ;;  %v1033_v54 = vsub.f32 %v1798_v62, %v1027_v46  ;;  %v1034_v57 = vsub.f32 %v1795_v56, %v1027_v46 }
 0x1d4   : > { %v1026_v47 = vpop.xlane.xlu0 %1025  ;;  %v1035_v58 = vsub.f32 %v1800_v63, %v1027_v46  ;;  %v1036_v60 = vsub.f32 %v876_v18, %v1027_v46  ;;  %v1037_v61 = vsub.f32 %v878_v26, %v1027_v46  ;;  %v1038_v0 = vsub.f32 %v947_v19, %v1027_v46 }
 0x1d5   : > { %v1028_v49 = vmul.f32 0.015625, %v1026_v47  ;;  %v1039_v1 = vsub.f32 %v949_v27, %v1027_v46 }
 0x1d7   : > { %v1030_v50 = vsub.f32 %v1028_v49, %v1029_v48 }
 0x1d9   : > { %v1031_v51 = vmax.f32 %v1030_v50, 0.0 }
 0x1db   : > { %v1040_v52 = vadd.f32 1e-05, %v1031_v51 }
 0x1dd   : > { %1348 = vrsqrt.f32 %v1040_v52 }
 0x1ea   : > { %v1349_v59 = vpop.eup %1348 }
 0x1eb   : > { %v1042_v2 = vmul.f32 %v1349_v59, %v1032_v53  ;;  %v1043_v3 = vmul.f32 %v1349_v59, %v1033_v54  ;;  %v1044_v4 = vmul.f32 %v1349_v59, %v1034_v57  ;;  %v1045_v5 = vmul.f32 %v1349_v59, %v1035_v58 }
 0x1ec   : > { %v1046_v55 = vmul.f32 %v1349_v59, %v1036_v60  ;;  %v1047_v6 = vmul.f32 %v1349_v59, %v1037_v61  ;;  %v1048_v62 = vmul.f32 %v1349_v59, %v1038_v0  ;;  %v1049_v56 = vmul.f32 %v1349_v59, %v1039_v1 }
 0x1ed   : > { %1050 = vst [vmem:[%s296_s27] sm:$0xff] %v1042_v2  ;;  %1051 = vst [vmem:[%s296_s27 + $0x8] sm:$0xff] %v1043_v3 }
 0x1ee   : > { %1052 = vst [vmem:[%s296_s27 + $0x10] sm:$0xff] %v1044_v4  ;;  %1053 = vst [vmem:[%s296_s27 + $0x18] sm:$0xff] %v1045_v5 }
 0x1ef   : > { %1054 = vst [vmem:[%s296_s27 + $0x20] sm:$0xff] %v1046_v55  ;;  %1055 = vst [vmem:[%s296_s27 + $0x28] sm:$0xff] %v1047_v6 }
 0x1f0   : > { %1056 = vst [vmem:[%s296_s27 + $0x30] sm:$0xff] %v1048_v62  ;;  %1057 = vst [vmem:[%s296_s27 + $0x38] sm:$0xff] %v1049_v56 }
 0x1f1   : > { %1469 = shalt.err (!%p1466_p8)
}
 0x1f2   : > { %s1470_s7 = scalar_lea.hbm %s1818_s18, 1024  ;;  %s1474_s6 = scalar_lea.hbm %s1870_s4, 2048 }
 0x1f3   : > { %p1471_p12 = scmp.ne.s32.totalorder %s1818_s18, %s1470_s7  ;;  %p1475_p10 = scmp.lt.s32.totalorder %s1818_s18, %s1870_s4 }
 0x1f4   : > { %p1476_p0 = scmp.lt.s32.totalorder %s1474_s6, %s1470_s7 }
 0x1f5   : > { %p1472_p5 = pnand %p1471_p12, %p1686_p13 }
 0x1f6   : > { %p1477_p9 = por %p1476_p0, %p1475_p10 }
 0x1f7   : > { %p1473_p7 = pneg %p1472_p5 }
 0x1f9   : > { %p1478_p1 = pnand %p1477_p9, %p1473_p7 }
 0x1fb   : > { %1481 = shalt.err (!%p1478_p1)
}
 0x1fc   : > { %1266 = dma.vmem_to_hbm [thread:$0]  (%p1686_p13), %s1820_s10, 1024, %s1818_s18, %s1059_s13  }
 0x1fd PF: > { %s1087_s2 = sand.u32 1, %s1524_s15   ;;  %p1891_p11 = scmp.ne.s32.totalorder %s1880_s26, 0 }
 0x1fe   : > { %p1892_p6 = scmp.ge.s32.totalorder %s1544_s20, 2  ;;  %s1088_s23 = scalar_lea.sflag [#allocation6], %s1087_s2 }
 0x200   : > { %p1283_p3 = pnand %p1892_p6, %p1891_p11 }
 0x202   : > { %p1284_p4 = pneg %p1283_p3 }
 0x204   : > { %1519 = dma.done.wait (%p1284_p4), %s1088_s23, 1024  }
 0x205   : > { %1521 = vsyncadd (%p1284_p4), %s1088_s23, 4294966272  ;;  %s22_s20 = sadd.s32 1, %s1544_s20   ;;  %s1893_s15 = smov %s1528_s16 }
 0x206   : > { %p19_p2 = scmp.ge.s32.totalorder %s22_s20, 4   ;;  %s1894_s16 = smov %s1532_s17 }
 0x207   : > { %s1895_s17 = smov %s1702_s24  ;;  %s1896_s18 = smov %s1540_s19 }
 0x208   : > { %s1897_s19 = smov %s1899_s30  ;;  %21 = sbr.rel (!%p19_p2) target bundleno = 11 (0xb), region = 98 }
 0x20d   :  { %1093 = vsyncpa [#allocation5], 1 }
 0x20e   :  { %1095 = vsyncpa [#allocation5 + $0x1], 1 }
 0x20f   :  { %1096 = vsyncpa [#allocation8], 1 }
 0x210   :  { %1097 = vsyncpa [#allocation11], 1 }
 0x211   :  { %1098 = vsyncpa [#allocation6], 1 }
 0x212   :  { %1100 = vsyncpa [#allocation6 + $0x1], 1 }

</bundles_post_ra>
